<compile_context>
chip_gen: v7x
topology: tpu7x:2x2x1
jax: 0.10.0
libtpu: 0.0.40
codegen_flags: <defaults>
</compile_context>

<pallas_src>
import functools

import jax
import jax.numpy as jnp
from jax import lax
from jax.experimental import pallas as pl
from jax.experimental.pallas import tpu as pltpu

_LANE = 128
_MAX_T_ROWS = 512    # fore block = 9*512*128*4B = 2.25 MiB (f32) -- safe on v5e/v6e/v7x
_MAX_T_COLS = 32768  # ragged-path lane tile (multiple of 128), fore block = 1.125 MiB


def _round_up(x, m):
    return ((x + m - 1) // m) * m


# ---------------------------------------------------------------------------
# Aligned path: H*W % 128 == 0, free reshape to (B, M, rows, 128).
# ---------------------------------------------------------------------------
def _l1_sum_kernel(fore_ref, obs_ref, out_ref, *, n_members, t_rows, rows_total):
    # fore_ref: (1, M, T, 128); obs_ref: (1, T, 128); out_ref: (1, 1, 1, 128)
    o = obs_ref[0].astype(jnp.float32)                               # (T, 128)
    acc = jnp.abs(fore_ref[0, 0].astype(jnp.float32) - o)            # (T, 128)
    for m in range(1, n_members):                                    # static unroll (M=9)
        acc = acc + jnp.abs(fore_ref[0, m].astype(jnp.float32) - o)
    if rows_total % t_rows != 0:
        # Edge spatial tile: zero the out-of-bounds (garbage) sublanes.
        row = (pl.program_id(1) * t_rows
               + lax.broadcasted_iota(jnp.int32, (t_rows, _LANE), 0))
        acc = jnp.where(row < rows_total, acc, 0.0)
    # One sublane (XLU) reduce per tile -> lane-dense (1, 128) partial sum.
    out_ref[0, 0] = jnp.sum(acc, axis=0, keepdims=True)


def _l1_sum_aligned(fore_f, obs_f, B, M, N):
    rows = N // _LANE
    t_rows = min(rows, _MAX_T_ROWS)
    if B == 1 and t_rows == rows and rows >= 16:
        # Make the grid splittable across v7x's two TensorCores.
        t_rows = _round_up(pl.cdiv(rows, 2), 8)
    if t_rows != rows:
        t_rows = _round_up(t_rows, 8)          # sublane-aligned unless full-dim block
    num_tiles = pl.cdiv(rows, t_rows)

    fore_r = fore_f.reshape(B, M, rows, _LANE)
    obs_r = obs_f.reshape(B, rows, _LANE)
    itemsize = jnp.dtype(fore_f.dtype).itemsize

    kernel = functools.partial(_l1_sum_kernel, n_members=M, t_rows=t_rows,
                               rows_total=rows)
    partials = pl.pallas_call(
        kernel,
        out_shape=jax.ShapeDtypeStruct((B, num_tiles, 1, _LANE), jnp.float32),
        grid=(B, num_tiles),
        in_specs=[
            pl.BlockSpec((1, M, t_rows, _LANE), lambda b, t: (b, 0, t, 0)),
            pl.BlockSpec((1, t_rows, _LANE), lambda b, t: (b, t, 0)),
        ],
        out_specs=pl.BlockSpec((1, 1, 1, _LANE), lambda b, t: (b, t, 0, 0)),
        compiler_params=pltpu.CompilerParams(
            dimension_semantics=("parallel", "parallel")),
        cost_estimate=pl.CostEstimate(
            flops=3 * B * M * N,
            transcendentals=0,
            bytes_accessed=B * (M + 1) * N * itemsize + B * num_tiles * _LANE * 4),
    )(fore_r, obs_r)
    return jnp.sum(partials, dtype=jnp.float32)


# ---------------------------------------------------------------------------
# Ragged fallback: H*W % 128 != 0.  Flat (B, M, N) layout, no padded copy of
# fore; the edge block's garbage columns are masked and OOB output columns are
# clipped on writeback.  Output is the member-reduced |diff| (B, 1, N) partial.
# ---------------------------------------------------------------------------
def _l1_sum_kernel_flat(fore_ref, obs_ref, out_ref, *, t_cols, n_total):
    # fore_ref: (1, M, TC); obs_ref: (1, 1, TC); out_ref: (1, 1, TC)
    f = fore_ref[0].astype(jnp.float32)                              # (M, TC)
    o = obs_ref[0].astype(jnp.float32)                               # (1, TC)
    acc = jnp.sum(jnp.abs(f - o), axis=0, keepdims=True)             # (1, TC)
    col = (pl.program_id(1) * t_cols
           + lax.broadcasted_iota(jnp.int32, (1, t_cols), 1))
    out_ref[0] = jnp.where(col < n_total, acc, 0.0)


def _l1_sum_flat(fore_f, obs_f, B, M, N):
    t_cols = min(_round_up(N, _LANE), _MAX_T_COLS)
    if B == 1 and t_cols >= N and N > 2 * _LANE:
        t_cols = _round_up(pl.cdiv(N, 2), _LANE)   # keep both v7x TCs busy
    num_tiles = pl.cdiv(N, t_cols)

    obs_r = obs_f.reshape(B, 1, N)
    itemsize = jnp.dtype(fore_f.dtype).itemsize

    kernel = functools.partial(_l1_sum_kernel_flat, t_cols=t_cols, n_total=N)
    partials = pl.pallas_call(
        kernel,
        out_shape=jax.ShapeDtypeStruct((B, 1, N), jnp.float32),
        grid=(B, num_tiles),
        in_specs=[
            pl.BlockSpec((1, M, t_cols), lambda b, t: (b, 0, t)),
            pl.BlockSpec((1, 1, t_cols), lambda b, t: (b, 0, t)),
        ],
        out_specs=pl.BlockSpec((1, 1, t_cols), lambda b, t: (b, 0, t)),
        compiler_params=pltpu.CompilerParams(
            dimension_semantics=("parallel", "parallel")),
        cost_estimate=pl.CostEstimate(
            flops=3 * B * M * N,
            transcendentals=0,
            bytes_accessed=B * (M + 1) * N * itemsize + B * N * 4),
    )(fore_f, obs_r)
    return jnp.sum(partials, dtype=jnp.float32)


# ---------------------------------------------------------------------------
# Public wrapper — matches the PyTorch module's forward semantics.
# ---------------------------------------------------------------------------
def l1_loss(fore, obs):
    """fore: (B, M=9, H, W); obs: (B, 1, H, W) or (B, H, W). Returns scalar f32."""
    B, M, H, W = fore.shape
    obs_sq = jnp.squeeze(obs, axis=1) if obs.ndim == 4 else obs  # safe for B == 1
    assert obs_sq.shape == (B, H, W)

    N = H * W
    fore_f = fore.reshape(B, M, N)   # free (contiguous) reshape, no transpose
    obs_f = obs_sq.reshape(B, N)

    if N % _LANE == 0:
        total = _l1_sum_aligned(fore_f, obs_f, B, M, N)
    else:
        total = _l1_sum_flat(fore_f, obs_f, B, M, N)

    # sum_i mean(|fore[:,i]-obs|) / M  ==  sum(|fore-obs|) / (M*B*H*W)
    return total / jnp.float32(M * B * H * W)


if __name__ == "__main__":
    key = jax.random.PRNGKey(0)

    def _check(B, H, W, k):
        k1, k2 = jax.random.split(k)
        fore = jax.random.normal(k1, (B, 9, H, W), dtype=jnp.float32)
        obs = jax.random.normal(k2, (B, 1, H, W), dtype=jnp.float32)
        out = l1_loss(fore, obs)
        jax.block_until_ready(out)
        ref = jnp.mean(jnp.abs(fore - obs))   # == (1/9) * sum_i mean(|fore[:,i]-obs|)
        assert jnp.allclose(out, ref, rtol=1e-5, atol=1e-6), (B, H, W, out, ref)

    k0, k1, k2 = jax.random.split(key, 3)
    _check(2, 16, 16, k0)   # aligned path (demo shape)
    _check(1, 48, 48, k1)   # aligned path, B==1 split + masked edge tile
    _check(2, 5, 5, k2)     # ragged path (H*W % 128 != 0), in-kernel mask
    print("KERNEL_OK")
</pallas_src>

<mosaic_0001>
module attributes {stable_mosaic.version = 11 : i64} {
  func.func @_l1_sum_kernel(%arg0: i32, %arg1: i32, %arg2: memref<1x9x2x128xf32, #tpu.memory_space<vmem>>, %arg3: memref<1x2x128xf32, #tpu.memory_space<vmem>>, %arg4: memref<1x1x1x128xf32, #tpu.memory_space<vmem>>) attributes {dimension_semantics = [#tpu.dimension_semantics<parallel>, #tpu.dimension_semantics<parallel>], iteration_bounds = array<i64: 2, 1>, scalar_prefetch = 0 : i64, scratch_operands = 0 : i64, tpu.core_type = #tpu.core_type<tc>, window_params = [{transform_indices = @transform_0, window_bounds = array<i64: 1, 9, 2, 128>}, {transform_indices = @transform_1, window_bounds = array<i64: 1, 2, 128>}, {transform_indices = @transform_2, window_bounds = array<i64: 1, 1, 1, 128>}]} {
    %c0 = arith.constant 0 : index
    %c0_0 = arith.constant 0 : index
    %c0_1 = arith.constant 0 : index
    %0 = vector.load %arg3[%c0, %c0_0, %c0_1] : memref<1x2x128xf32, #tpu.memory_space<vmem>>, vector<1x2x128xf32>
    %1 = vector.shape_cast %0 : vector<1x2x128xf32> to vector<2x128xf32>
    %c0_2 = arith.constant 0 : index
    %c0_3 = arith.constant 0 : index
    %c0_4 = arith.constant 0 : index
    %c0_5 = arith.constant 0 : index
    %2 = vector.load %arg2[%c0_2, %c0_3, %c0_4, %c0_5] : memref<1x9x2x128xf32, #tpu.memory_space<vmem>>, vector<1x1x2x128xf32>
    %3 = vector.shape_cast %2 : vector<1x1x2x128xf32> to vector<2x128xf32>
    %4 = arith.subf %3, %1 : vector<2x128xf32>
    %5 = math.absf %4 : vector<2x128xf32>
    %c0_6 = arith.constant 0 : index
    %c1 = arith.constant 1 : index
    %c0_7 = arith.constant 0 : index
    %c0_8 = arith.constant 0 : index
    %6 = vector.load %arg2[%c0_6, %c1, %c0_7, %c0_8] : memref<1x9x2x128xf32, #tpu.memory_space<vmem>>, vector<1x1x2x128xf32>
    %7 = vector.shape_cast %6 : vector<1x1x2x128xf32> to vector<2x128xf32>
    %8 = arith.subf %7, %1 : vector<2x128xf32>
    %9 = math.absf %8 : vector<2x128xf32>
    %10 = arith.addf %5, %9 : vector<2x128xf32>
    %c0_9 = arith.constant 0 : index
    %c2 = arith.constant 2 : index
    %c0_10 = arith.constant 0 : index
    %c0_11 = arith.constant 0 : index
    %11 = vector.load %arg2[%c0_9, %c2, %c0_10, %c0_11] : memref<1x9x2x128xf32, #tpu.memory_space<vmem>>, vector<1x1x2x128xf32>
    %12 = vector.shape_cast %11 : vector<1x1x2x128xf32> to vector<2x128xf32>
    %13 = arith.subf %12, %1 : vector<2x128xf32>
    %14 = math.absf %13 : vector<2x128xf32>
    %15 = arith.addf %10, %14 : vector<2x128xf32>
    %c0_12 = arith.constant 0 : index
    %c3 = arith.constant 3 : index
    %c0_13 = arith.constant 0 : index
    %c0_14 = arith.constant 0 : index
    %16 = vector.load %arg2[%c0_12, %c3, %c0_13, %c0_14] : memref<1x9x2x128xf32, #tpu.memory_space<vmem>>, vector<1x1x2x128xf32>
    %17 = vector.shape_cast %16 : vector<1x1x2x128xf32> to vector<2x128xf32>
    %18 = arith.subf %17, %1 : vector<2x128xf32>
    %19 = math.absf %18 : vector<2x128xf32>
    %20 = arith.addf %15, %19 : vector<2x128xf32>
    %c0_15 = arith.constant 0 : index
    %c4 = arith.constant 4 : index
    %c0_16 = arith.constant 0 : index
    %c0_17 = arith.constant 0 : index
    %21 = vector.load %arg2[%c0_15, %c4, %c0_16, %c0_17] : memref<1x9x2x128xf32, #tpu.memory_space<vmem>>, vector<1x1x2x128xf32>
    %22 = vector.shape_cast %21 : vector<1x1x2x128xf32> to vector<2x128xf32>
    %23 = arith.subf %22, %1 : vector<2x128xf32>
    %24 = math.absf %23 : vector<2x128xf32>
    %25 = arith.addf %20, %24 : vector<2x128xf32>
    %c0_18 = arith.constant 0 : index
    %c5 = arith.constant 5 : index
    %c0_19 = arith.constant 0 : index
    %c0_20 = arith.constant 0 : index
    %26 = vector.load %arg2[%c0_18, %c5, %c0_19, %c0_20] : memref<1x9x2x128xf32, #tpu.memory_space<vmem>>, vector<1x1x2x128xf32>
    %27 = vector.shape_cast %26 : vector<1x1x2x128xf32> to vector<2x128xf32>
    %28 = arith.subf %27, %1 : vector<2x128xf32>
    %29 = math.absf %28 : vector<2x128xf32>
    %30 = arith.addf %25, %29 : vector<2x128xf32>
    %c0_21 = arith.constant 0 : index
    %c6 = arith.constant 6 : index
    %c0_22 = arith.constant 0 : index
    %c0_23 = arith.constant 0 : index
    %31 = vector.load %arg2[%c0_21, %c6, %c0_22, %c0_23] : memref<1x9x2x128xf32, #tpu.memory_space<vmem>>, vector<1x1x2x128xf32>
    %32 = vector.shape_cast %31 : vector<1x1x2x128xf32> to vector<2x128xf32>
    %33 = arith.subf %32, %1 : vector<2x128xf32>
    %34 = math.absf %33 : vector<2x128xf32>
    %35 = arith.addf %30, %34 : vector<2x128xf32>
    %c0_24 = arith.constant 0 : index
    %c7 = arith.constant 7 : index
    %c0_25 = arith.constant 0 : index
    %c0_26 = arith.constant 0 : index
    %36 = vector.load %arg2[%c0_24, %c7, %c0_25, %c0_26] : memref<1x9x2x128xf32, #tpu.memory_space<vmem>>, vector<1x1x2x128xf32>
    %37 = vector.shape_cast %36 : vector<1x1x2x128xf32> to vector<2x128xf32>
    %38 = arith.subf %37, %1 : vector<2x128xf32>
    %39 = math.absf %38 : vector<2x128xf32>
    %40 = arith.addf %35, %39 : vector<2x128xf32>
    %c0_27 = arith.constant 0 : index
    %c8 = arith.constant 8 : index
    %c0_28 = arith.constant 0 : index
    %c0_29 = arith.constant 0 : index
    %41 = vector.load %arg2[%c0_27, %c8, %c0_28, %c0_29] : memref<1x9x2x128xf32, #tpu.memory_space<vmem>>, vector<1x1x2x128xf32>
    %42 = vector.shape_cast %41 : vector<1x1x2x128xf32> to vector<2x128xf32>
    %43 = arith.subf %42, %1 : vector<2x128xf32>
    %44 = math.absf %43 : vector<2x128xf32>
    %45 = arith.addf %40, %44 : vector<2x128xf32>
    %cst = arith.constant dense<0.000000e+00> : vector<128xf32>
    %46 = vector.multi_reduction <add>, %45, %cst [0] : vector<2x128xf32> to vector<128xf32>
    %47 = vector.shape_cast %46 : vector<128xf32> to vector<1x128xf32>
    %c0_30 = arith.constant 0 : index
    %c0_31 = arith.constant 0 : index
    %c0_32 = arith.constant 0 : index
    %c0_33 = arith.constant 0 : index
    %48 = vector.load %arg4[%c0_30, %c0_31, %c0_32, %c0_33] : memref<1x1x1x128xf32, #tpu.memory_space<vmem>>, vector<1x1x1x128xf32>
    %49 = vector.shape_cast %48 : vector<1x1x1x128xf32> to vector<1x128xf32>
    %50 = vector.shape_cast %47 : vector<1x128xf32> to vector<1x1x1x128xf32>
    tpu.vector_store %arg4[%c0_30, %c0_31, %c0_32, %c0_33], %50 {strides = array<i32>} : memref<1x1x1x128xf32, #tpu.memory_space<vmem>>, vector<1x1x1x128xf32>,
    return
  }
  func.func @transform_0(%arg0: i32, %arg1: i32) -> (i32, i32, i32, i32) {
    %c0_i32 = arith.constant 0 : i32
    %c0_i32_0 = arith.constant 0 : i32
    %c0_i32_1 = arith.constant 0 : i32
    return %arg0, %c0_i32, %arg1, %c0_i32_0 : i32, i32, i32, i32
  }
  func.func @transform_1(%arg0: i32, %arg1: i32) -> (i32, i32, i32) {
    %c0_i32 = arith.constant 0 : i32
    %c0_i32_0 = arith.constant 0 : i32
    return %arg0, %arg1, %c0_i32 : i32, i32, i32
  }
  func.func @transform_2(%arg0: i32, %arg1: i32) -> (i32, i32, i32, i32) {
    %c0_i32 = arith.constant 0 : i32
    %c0_i32_0 = arith.constant 0 : i32
    %c0_i32_1 = arith.constant 0 : i32
    return %arg0, %arg1, %c0_i32, %c0_i32_0 : i32, i32, i32, i32
  }
}

</mosaic_0001>

<bundles_post_ra>
// kernel: tpu_custom_call.1
= control target key start
LH: loop header
LB: loop body
LE: loop exit
PB: predicated region body
PF: predicated region fallthrough
CT: control target
= control target key end

     0   :  { %7 = vsyncpa [#allocation3], 0  ;;  %s873_s0 = inlined_call_operand.hbm [shape: f32[2,9,2,128], index: 0, kind: input, shape index: {}]   ;;  %s874_s1 = inlined_call_operand.hbm [shape: f32[2,2,128], index: 1, kind: input, shape index: {}]   ;;  %s875_s2 = inlined_call_operand.hbm [shape: f32[2,1,1,128], index: 2, kind: output, shape index: {}]  }
   0x1   :  { %9 = vsyncpa [#allocation3 + $0x1], 0 }
   0x2   :  { %10 = vsyncpa [#allocation6], 0 }
   0x3   :  { %12 = vsyncpa [#allocation6 + $0x1], 0 }
   0x4   :  { %13 = vsyncpa [#allocation4], 0 }
   0x5   :  { %15 = vsyncpa [#allocation4 + $0x1], 0  ;;  %s646_s9 = smov 0   ;;  %s648_s10 = smov 0  }
   0x6   :  { %s650_s11 = smov 0   ;;  %s652_s12 = smov 0  }
   0x7   :  { %s654_s13 = smov 0   ;;  %s656_s14 = smov 0  }
   0x8 LB: > { %s386_s15 = sadd.s32 4294967295, %s624_s14   ;;  %s387_s16 = sadd.s32 4294967294, %s624_s14   ;;  %s624_s14 = sphi %s656_s14, %s21_s14   ;;  %s620_s13 = sphi %s654_s13, %s894_s13   ;;  %s616_s12 = sphi %s652_s12, %s893_s12   ;;  %s612_s11 = sphi %s650_s11, %s892_s11   ;;  %s608_s10 = sphi %s648_s10, %s891_s10   ;;  %s604_s9 = sphi %s646_s9, %s890_s9  }
   0x9   : > { %s33_s17 = sadd.s32 1, %s620_s13  ;;  %s42_s18 = sadd.s32 1, %s612_s11 }
   0xa   : > { %p35_p0 = scmp.ge.s32.totalorder %s33_s17, 2  ;;  %p49_p1 = scmp.ne.s32.totalorder %s612_s11, %s608_s10 }
   0xb   : > { %p50_p2 = scmp.eq.s32.totalorder %s624_s14, 0  ;;  %p55_p3 = scmp.ne.s32.totalorder %s608_s10, %s604_s9 }
   0xc   : > { %s896_s17 = smov (%p35_p0, %s33_s17), 0  ;;  %p56_p5 = scmp.eq.s32.totalorder %s386_s15, 0 }
   0xd   : > { %p687_p4 = por %p50_p2, %p49_p1  ;;  %s37_s20 = ssub.s32 %s620_s13, %s896_s17 }
   0xe   : > { %p109_p6 = scmp.eq.s32.totalorder %s386_s15, 1  ;;  %p40_p7 = scmp.eq.s32.totalorder %s37_s20, 0 }
   0xf   : > { %p693_p8 = por %p56_p5, %p55_p3  ;;  %p115_p10 = scmp.eq.s32.totalorder %s387_s16, 1 }
  0x10   : > { %p697_p9 = por %p109_p6, %p49_p1  ;;  %p426_p13 = scmp.lt.s32.totalorder %s624_s14, 2 }
  0x11   : > { %s879_s21 = scalar_select %p693_p8, 1, 0 }
  0x12   : > { %s880_s22 = scalar_select %p697_p9, 1, 0 }
  0x13   : > { %s702_s23 = scalar_select %p40_p7, %s612_s11, %s42_s18  }
  0x14   : > { %p704_p11 = por %p115_p10, %p55_p3  ;;  %s711_s25 = sand.u32 1, %s612_s11  }
  0x15   : > { %s406_s26 = smul.u32 18, %s711_s25  ;;  %p717_p0 = pnand %p426_p13, %p687_p4 }
  0x16   : > { %s881_s24 = scalar_select %p704_p11, 1, 0 }
  0x17   : > { %s407_s27 = smul.u32 288, %s620_s13  ;;  %s139_s4 = scalar_lea.vmem [#allocation2], %s406_s26 }
  0x18   : > { %s147_s5 = sshll.u32 %s139_s4, 4  ;;  %s136_s6 = scalar_lea.sflag [#allocation3], %s711_s25  ;;  %s726_s5 = int_to_ptr.vmem [resolvable:$true] %s147_s5 }
  0x19   : > { %s724_s3 = scalar_lea.hbm %s873_s0, %s407_s27  ;;  %p480_p3 = pneg %p717_p0 }
  0x1a   : > { %s478_s7 = scalar_lea.hbm %s724_s3, 288  ;;  %s483_s16 = scalar_lea.hbm %s873_s0, 576 }
  0x1b   : > { %p479_p2 = scmp.ne.s32.totalorder %s724_s3, %s478_s7  ;;  %p484_p6 = scmp.lt.u32.totalorder %s724_s3, %s873_s0 }
  0x1c   : > { %p485_p7 = scmp.lt.u32.totalorder %s483_s16, %s478_s7  ;;  %p487_p13 = scmp.lt.u32.totalorder %s478_s7, %s724_s3 }
  0x1d   : > { %p481_p4 = pnand %p480_p3, %p479_p2 }
  0x1e   : > { %p486_p10 = por %p485_p7, %p484_p6 }
  0x1f   : > { %p482_p5 = pneg %p481_p4 }
  0x20   : > { %p488_p12 = por %p487_p13, %p486_p10 }
  0x22   : > { %p489_p1 = pnand %p488_p12, %p482_p5 }
  0x24   : > { %492 = shalt.err (!%p489_p1)
}
  0x25   : > { %s493_s20 = scalar_lea.vmem %s726_s5, 288  ;;  %s626_s26 = smov [#allocation2]  }
  0x26   : > { %p494_p2 = scmp.ne.s32.totalorder %s726_s5, %s493_s20  ;;  %s498_s27 = sshll.u32 %s626_s26, 4  ;;  %s499_s27 = int_to_ptr.vmem [resolvable:$false] %s498_s27 }
  0x27   : > { %s500_s29 = scalar_lea.vmem %s499_s27, 576  ;;  %p501_p9 = scmp.lt.s32.totalorder %s726_s5, %s499_s27 }
  0x28   : > { %p496_p4 = pnand %p494_p2, %p480_p3  ;;  %p502_p6 = scmp.lt.s32.totalorder %s500_s29, %s493_s20 }
  0x2a   : > { %p497_p11 = pneg %p496_p4  ;;  %p503_p7 = por %p502_p6, %p501_p9 }
  0x2c   : > { %p504_p10 = pnand %p503_p7, %p497_p11 }
  0x2e   : > { %507 = shalt.err (!%p504_p10)
}
  0x2f   : > { %s627_s30 = smov 32   ;;  %s628_s4 = smov 2  }
  0x30   : > { %418 = dma.hbm_to_vmem [thread:$0]  (!%p717_p0), %s724_s3, 288, %s726_s5, %s136_s6, %s627_s30, %s627_s30, %s628_s4  }
  0x31   : > { %p174_p12 = scmp.lt.s32.totalorder %s624_s14, 3  ;;  %s391_s7 = sshll.u32 %s711_s25, 1 }
  0x32   : > { %s392_s8 = sshll.u32 %s620_s13, 5  ;;  %p883_p9 = scmp.ge.s32.totalorder %s624_s14, 1 }
  0x33   : > { %s769_s19 = scalar_lea.hbm %s874_s1, %s392_s8  ;;  %s161_s20 = scalar_lea.vmem [#allocation5], %s391_s7 }
  0x34   : > { %p762_p11 = pnand %p883_p9, %p174_p12  ;;  %s169_s26 = sshll.u32 %s161_s20, 4  ;;  %s170_s26 = int_to_ptr.vmem [resolvable:$true] %s169_s26 }
  0x35   : > { %s158_s3 = scalar_lea.sflag [#allocation6], %s711_s25  ;;  %s508_s5 = scalar_lea.hbm %s769_s19, 32 }
  0x36   : > { %s884_s15 = scalar_select %p762_p11, 1, 0 }
  0x37   : > { %p509_p1 = scmp.ne.s32.totalorder %s769_s19, %s508_s5  ;;  %s513_s29 = scalar_lea.hbm %s874_s1, 64 }
  0x38   : > { %p514_p2 = scmp.lt.u32.totalorder %s769_s19, %s874_s1  ;;  %p515_p4 = scmp.lt.u32.totalorder %s513_s29, %s508_s5 }
  0x39   : > { %p511_p5 = pnand %p509_p1, %p480_p3  ;;  %p517_p7 = scmp.lt.u32.totalorder %s508_s5, %s769_s19 }
  0x3a   : > { %p516_p6 = por %p515_p4, %p514_p2 }
  0x3b   : > { %p512_p13 = pneg %p511_p5 }
  0x3c   : > { %p518_p10 = por %p517_p7, %p516_p6 }
  0x3e   : > { %p519_p12 = pnand %p518_p10, %p512_p13 }
  0x40   : > { %522 = shalt.err (!%p519_p12)
}
  0x41   : > { %s523_s25 = scalar_lea.vmem %s170_s26, 32  ;;  %s629_s7 = smov [#allocation5]  }
  0x42   : > { %p524_p9 = scmp.ne.s32.totalorder %s170_s26, %s523_s25  ;;  %s528_s8 = sshll.u32 %s629_s7, 4  ;;  %s529_s8 = int_to_ptr.vmem [resolvable:$false] %s528_s8 }
  0x43   : > { %s530_s16 = scalar_lea.vmem %s529_s8, 64  ;;  %p531_p8 = scmp.lt.s32.totalorder %s170_s26, %s529_s8 }
  0x44   : > { %p526_p1 = pnand %p524_p9, %p480_p3  ;;  %p532_p11 = scmp.lt.s32.totalorder %s530_s16, %s523_s25 }
  0x46   : > { %p527_p5 = pneg %p526_p1  ;;  %p533_p2 = por %p532_p11, %p531_p8 }
  0x48   : > { %p534_p4 = pnand %p533_p2, %p527_p5 }
  0x4a   : > { %537 = shalt.err (!%p534_p4)
}
  0x4b   : > { %421 = dma.hbm_to_vmem [thread:$0]  (!%p717_p0), %s769_s19, 32, %s170_s26, %s158_s3  }
  0x4c   : > { %p885_p13 = scmp.ne.s32.totalorder %s884_s15, 0 }
  0x4d   : > { %s794_s18 = sand.u32 (!%p885_p13), 1, %s608_s10   ;;  %p886_p8 = scmp.ne.s32.totalorder (!%p885_p13), %s879_s21, 0 }
  0x4e   : > { %178 = sbr.rel (%p885_p13) target bundleno = 138 (0x8a), region = 28  ;;  %s181_s5 = scalar_lea.sflag (!%p885_p13), [#allocation3], %s794_s18 }
  0x4f   : > { %s408_s20 = smul.u32 (!%p885_p13), 18, %s794_s18 }
  0x51   : > { %s798_s6 = scalar_lea.vmem (!%p885_p13), [#allocation2], %s408_s20 }
  0x55   : > { %591 = dma.done.wait (%p886_p8), %s181_s5, 288  }
  0x56   : > { %593 = vsyncadd (%p886_p8), %s181_s5, 4294967008  ;;  %s394_s28 = sshll.u32 %s794_s18, 1  ;;  %s190_s15 = scalar_lea.sflag [#allocation6], %s794_s18 }
  0x57   : > { %s193_s19 = scalar_lea.vmem [#allocation5], %s394_s28 }
  0x58   : > { %595 = dma.done.wait (%p886_p8), %s190_s15, 32  }
  0x59   : > { %597 = vsyncadd (%p886_p8), %s190_s15, 4294967264  ;;  %v218_v0 = vld [vmem:[%s193_s19] sm:$0x3]  ;;  %v219_v1 = vld [vmem:[%s798_s6] sm:$0x3]  ;;  %vm262_vm0 = vcmask 1041408  }
  0x5a   : > { %v395_v2 = vld [vmem:[%s798_s6 + $0x2] sm:$0x3]  ;;  %v220_v3 = vsub.f32 %v219_v1, %v218_v0  ;;  %v396_v5 = vld [vmem:[%s798_s6 + $0x4] sm:$0x3]  ;;  %v397_v6 = vld [vmem:[%s798_s6 + $0x6] sm:$0x3] }
  0x5b   : > { %v224_v4 = vsub.f32 %v395_v2, %v218_v0  ;;  %v398_v7 = vld [vmem:[%s798_s6 + $0x8] sm:$0x3]  ;;  %v229_v8 = vsub.f32 %v396_v5, %v218_v0  ;;  %v234_v9 = vsub.f32 %v397_v6, %v218_v0  ;;  %v399_v10 = vld [vmem:[%s798_s6 + $0xa] sm:$0x3]  ;;  %v400_v15 = vld [vmem:[%s798_s6 + $0xc] sm:$0x3] }
  0x5c   : > { %v221_v11 = vand.u32 2147483647, %v220_v3  ;;  %v239_v13 = vsub.f32 %v398_v7, %v218_v0  ;;  %v244_v18 = vsub.f32 %v399_v10, %v218_v0  ;;  %v401_v19 = vld [vmem:[%s798_s6 + $0xe] sm:$0x3]  ;;  %v249_v22 = vsub.f32 %v400_v15, %v218_v0  ;;  %v402_v23 = vld [vmem:[%s798_s6 + $0x10] sm:$0x3] }
  0x5d   : > { %v225_v12 = vand.u32 2147483647, %v224_v4  ;;  %v230_v14 = vand.u32 2147483647, %v229_v8  ;;  %v235_v17 = vand.u32 2147483647, %v234_v9  ;;  %v254_v26 = vsub.f32 %v401_v19, %v218_v0 }
  0x5e   : > { %v240_v21 = vand.u32 2147483647, %v239_v13  ;;  %v245_v25 = vand.u32 2147483647, %v244_v18  ;;  %v250_v28 = vand.u32 2147483647, %v249_v22  ;;  %v259_v29 = vsub.f32 %v402_v23, %v218_v0 }
  0x5f   : > { %v226_v16 = vadd.f32 %v225_v12, %v221_v11  ;;  %v255_v31 = vand.u32 2147483647, %v254_v26  ;;  %s217_s21 = scalar_lea.vmem [#allocation7], %s794_s18  ;;  %s403_s3 = sshll.u32 %s616_s12, 4 }
  0x60   : > { %v260_v33 = vand.u32 2147483647, %v259_v29  ;;  %s285_s26 = sshll.u32 %s217_s21, 4  ;;  %s826_s30 = scalar_lea.hbm %s875_s2, %s403_s3  ;;  %s821_s26 = int_to_ptr.vmem [resolvable:$true] %s285_s26 }
  0x61   : > { %v231_v20 = vadd.f32 %v230_v14, %v226_v16  ;;  %s272_s4 = scalar_lea.sflag [#allocation4], %s794_s18  ;;  %s538_s25 = scalar_lea.vmem %s821_s26, 16 }
  0x62   : > { %p539_p0 = scmp.ne.s32.totalorder %s821_s26, %s538_s25  ;;  %p887_p3 = scmp.ne.s32.totalorder %s880_s22, 0 }
  0x63   : > { %v236_v24 = vadd.f32 %v235_v17, %v231_v20  ;;  %s630_s12 = smov [#allocation7]  }
  0x64   : > { %p540_p11 = pnand %p539_p0, %p887_p3  ;;  %s542_s7 = sshll.u32 %s630_s12, 4  ;;  %s543_s7 = int_to_ptr.vmem [resolvable:$false] %s542_s7 }
  0x65   : > { %v241_v27 = vadd.f32 %v240_v21, %v236_v24  ;;  %s544_s8 = scalar_lea.vmem %s543_s7, 32  ;;  %p545_p7 = scmp.lt.s32.totalorder %s821_s26, %s543_s7 }
  0x66   : > { %p541_p6 = pneg %p540_p11  ;;  %p546_p10 = scmp.lt.s32.totalorder %s544_s8, %s538_s25 }
  0x67   : > { %v246_v30 = vadd.f32 %v245_v25, %v241_v27 }
  0x68   : > { %p547_p12 = por %p546_p10, %p545_p7 }
  0x69   : > { %v251_v32 = vadd.f32 %v250_v28, %v246_v30 }
  0x6a   : > { %p548_p9 = pnand %p547_p12, %p541_p6 }
  0x6b   : > { %v256_v34 = vadd.f32 %v255_v31, %v251_v32 }
  0x6d   : > { %v261_v35 = vadd.f32 %v260_v33, %v256_v34 }
  0x6f   : > { %v263_v36 = vsel %vm262_vm0, %v261_v35, 0.0 }
  0x70   : > { %v264_v37 = vrot.slane %v263_v36, 4 }
  0x72   : > { %v265_v38 = vadd.f32 %v264_v37, %v263_v36 }
  0x74   : > { %v266_v39 = vrot.slane %v265_v38, 2 }
  0x76   : > { %v267_v40 = vadd.f32 %v266_v39, %v265_v38 }
  0x78   : > { %v268_v41 = vrot.slane %v267_v40, 1 }
  0x7a   : > { %v269_v42 = vadd.f32 %v268_v41, %v267_v40 }
  0x7c   : > { %270 = vst [vmem:[%s217_s21] sm:$0x1] %v269_v42 }
  0x7d   : > { %551 = shalt.err (!%p548_p9)
}
  0x7e   : > { %s552_s16 = scalar_lea.hbm %s826_s30, 16  ;;  %s556_s5 = scalar_lea.hbm %s875_s2, 32 }
  0x7f   : > { %p553_p1 = scmp.ne.s32.totalorder %s826_s30, %s552_s16  ;;  %p557_p4 = scmp.lt.u32.totalorder %s826_s30, %s875_s2 }
  0x80   : > { %p558_p13 = scmp.lt.u32.totalorder %s556_s5, %s552_s16  ;;  %p560_p0 = scmp.lt.u32.totalorder %s552_s16, %s826_s30 }
  0x81   : > { %p554_p5 = pnand %p553_p1, %p887_p3 }
  0x82   : > { %p559_p8 = por %p558_p13, %p557_p4 }
  0x83   : > { %p555_p2 = pneg %p554_p5 }
  0x84   : > { %p561_p11 = por %p560_p0, %p559_p8 }
  0x86   : > { %p562_p6 = pnand %p561_p11, %p555_p2 }
  0x88   : > { %565 = shalt.err (!%p562_p6)
}
  0x89   : > { %413 = dma.vmem_to_hbm [thread:$0]  (%p887_p3), %s821_s26, 16, %s826_s30, %s272_s4  }
  0x8a PF: > { %s297_s15 = sand.u32 1, %s604_s9   ;;  %p888_p7 = scmp.ne.s32.totalorder %s881_s24, 0 }
  0x8b   : > { %p889_p10 = scmp.ge.s32.totalorder %s624_s14, 2  ;;  %s298_s19 = scalar_lea.sflag [#allocation4], %s297_s15 }
  0x8d   : > { %p423_p12 = pnand %p889_p10, %p888_p7 }
  0x8f   : > { %599 = dma.done.wait (!%p423_p12), %s298_s19, 16  }
  0x90   : > { %601 = vsyncadd (!%p423_p12), %s298_s19, 4294967280  ;;  %s21_s14 = sadd.s32 1, %s624_s14   ;;  %s890_s9 = smov %s608_s10 }
  0x91   : > { %p18_p9 = scmp.ge.s32.totalorder %s21_s14, 4   ;;  %s891_s10 = smov %s612_s11 }
  0x92   : > { %s892_s11 = smov %s702_s23  ;;  %s893_s12 = smov %s620_s13 }
  0x93   : > { %s894_s13 = smov %s896_s17  ;;  %20 = sbr.rel (!%p18_p9) target bundleno = 8 (0x8), region = 94 }
  0x9a   :  { %302 = vsyncpa [#allocation3], 1 }
  0x9b   :  { %304 = vsyncpa [#allocation3 + $0x1], 1 }
  0x9c   :  { %305 = vsyncpa [#allocation6], 1 }
  0x9d   :  { %307 = vsyncpa [#allocation6 + $0x1], 1 }
  0x9e   :  { %308 = vsyncpa [#allocation4], 1 }
  0x9f   :  { %310 = vsyncpa [#allocation4 + $0x1], 1 }

</bundles_post_ra>
